<compile_context>
chip_gen: v5e
topology: v5e:2x2
jax: 0.10.0
libtpu: 0.0.40
codegen_flags: <defaults>
</compile_context>

<pallas_src>
import functools

import jax
import jax.numpy as jnp
from jax.experimental import pallas as pl
from jax.experimental.pallas import tpu as pltpu


# ---------------------------------------------------------------------------
# padding constants
# ---------------------------------------------------------------------------
_KP = 32      # im2col contraction dim (C_in*3*3 = 27) padded to sublane mult
_CSP = 128    # conv-stem channels padded to one full lane width
_LP = 128     # latent output padded to one full lane width (sliced outside)


def _round_up(x, m):
    return (x + m - 1) // m * m


# ---------------------------------------------------------------------------
# Kernel 1: conv stem (im2col matmul) + ReLU + fused partial global-avg-pool
#   grid = (N, S_tiles); output [N, 8, CSP] holds per-image partial channel
#   sums (accumulated across the "arbitrary" spatial axis).  Folding TS rows
#   into 8 sublane rows is done with pure VPU adds (vreg-aligned reshape).
# ---------------------------------------------------------------------------
def _conv_gap_kernel(p_ref, w_ref, b_ref, o_ref, *, ts, s_actual):
    s = pl.program_id(1)

    @pl.when(s == 0)
    def _():
        o_ref[...] = jnp.zeros_like(o_ref)

    conv = jnp.dot(p_ref[0], w_ref[...],
                   preferred_element_type=jnp.float32)          # [TS, CSP] f32
    conv = jnp.maximum(conv + b_ref[...], 0.0)

    # mask spatial rows beyond the true extent (S was padded to a TS multiple)
    rows = jax.lax.broadcasted_iota(jnp.int32, (ts, 1), 0)
    conv = jnp.where(s * ts + rows < s_actual, conv, 0.0)

    # partial pool: fold TS rows into 8 sublane rows (VPU adds only)
    part = conv.reshape(ts // 8, 8, _CSP).sum(axis=0)           # [8, CSP]
    o_ref[...] += part[None]


# ---------------------------------------------------------------------------
# Kernel 2: GAP finish + proj-512 + ReLU + Linear(512,256) + ReLU + latent
#   grid over batch tiles; all weights use constant index_maps so they stay
#   resident in VMEM across grid steps.
# ---------------------------------------------------------------------------
def _head_kernel(ps_ref, wbb_ref, bbb_ref, w1_ref, b1_ref, w2_ref, b2_ref,
                 o_ref, *, inv_s):
    pooled = ps_ref[...].sum(axis=1) * inv_s                    # [TN, CSP]
    bb = jnp.dot(pooled, wbb_ref[...],
                 preferred_element_type=jnp.float32) + bbb_ref[...]
    x = jnp.maximum(bb, 0.0)                                    # backbone ReLU
    h = jnp.dot(x, w1_ref[...],
                preferred_element_type=jnp.float32) + b1_ref[...]
    h = jnp.maximum(h, 0.0)
    o_ref[...] = jnp.dot(h, w2_ref[...],
                         preferred_element_type=jnp.float32) + b2_ref[...]


# ---------------------------------------------------------------------------
# im2col producer (pure JAX reshuffle, bf16, K padded to 32, S padded to tile)
# ---------------------------------------------------------------------------
def _im2col(x, kh, kw, stride, pad, s_pad):
    n, c, h, w = x.shape
    xp = jnp.pad(x, ((0, 0), (0, 0), (pad, pad), (pad, pad)))
    ho = (h + 2 * pad - kh) // stride + 1
    wo = (w + 2 * pad - kw) // stride + 1
    cols = []
    for i in range(kh):
        for j in range(kw):
            cols.append(xp[:, :, i:i + stride * ho:stride,
                           j:j + stride * wo:stride])           # [N, C, Ho, Wo]
    patches = jnp.stack(cols, axis=2)                           # [N, C, 9, Ho, Wo]
    patches = patches.transpose(0, 3, 4, 1, 2).reshape(n, ho * wo, c * kh * kw)
    patches = jnp.pad(patches, ((0, 0), (0, s_pad - ho * wo),
                                (0, _KP - c * kh * kw)))
    return patches, ho, wo
    # TODO(synk): build the 9 shifted patch views inside the kernel (DMA a
    #             padded row band + pl.ds / pltpu.roll) to avoid the 9x
    #             im2col inflation in HBM entirely.


# ---------------------------------------------------------------------------
# Encoder forward
# ---------------------------------------------------------------------------
@functools.partial(jax.jit, static_argnames=("stride", "pad"))
def encoder_forward(x, params, *, stride=2, pad=1):
    # x.type(torch.cuda.FloatTensor): activations kept bf16 into the MXU;
    # all accumulation / bias / ReLU stays f32 via preferred_element_type.
    x = x.astype(jnp.bfloat16)
    n, c_in, h, w = x.shape

    ho = (h + 2 * pad - 3) // stride + 1
    wo = (w + 2 * pad - 3) // stride + 1
    s = ho * wo
    ts = min(256, _round_up(s, 8))          # spatial row tile (mult of 8)
    sp = _round_up(s, ts)
    s_tiles = sp // ts

    patches, _, _ = _im2col(x, 3, 3, stride, pad, sp)           # [N, Sp, 32] bf16

    cs = params["w_conv"].shape[1]
    latent_dim = params["w2"].shape[1]
    f_out = params["w_bb"].shape[1]         # 512
    f_mid = params["w1"].shape[1]           # 256

    # lane-dense / sublane-aligned padded weights (zero pads keep math exact)
    w_conv = jnp.pad(params["w_conv"],
                     ((0, _KP - params["w_conv"].shape[0]),
                      (0, _CSP - cs))).astype(jnp.bfloat16)
    b_conv = jnp.pad(params["b_conv"], ((0, 0), (0, _CSP - cs)))
    w_bb = jnp.pad(params["w_bb"], ((0, _CSP - cs), (0, 0)))
    b_bb = params["b_bb"]
    w1, b1 = params["w1"], params["b1"]
    w2 = jnp.pad(params["w2"], ((0, 0), (0, _LP - latent_dim)))
    b2 = jnp.pad(params["b2"], ((0, 0), (0, _LP - latent_dim)))

    # ---- kernel 1: conv stem + ReLU + partial GAP -------------------------
    conv_cost = pl.CostEstimate(
        flops=2 * n * sp * _KP * _CSP,
        transcendentals=0,
        bytes_accessed=int(patches.size * 2 + w_conv.size * 2
                           + b_conv.size * 4 + n * 8 * _CSP * 4))
    psums = pl.pallas_call(
        functools.partial(_conv_gap_kernel, ts=ts, s_actual=s),
        out_shape=jax.ShapeDtypeStruct((n, 8, _CSP), jnp.float32),
        grid_spec=pltpu.PrefetchScalarGridSpec(
            num_scalar_prefetch=0,
            grid=(n, s_tiles),
            in_specs=[
                pl.BlockSpec((1, ts, _KP), lambda i, j: (i, j, 0)),
                pl.BlockSpec((_KP, _CSP), lambda i, j: (0, 0)),
                pl.BlockSpec((1, _CSP), lambda i, j: (0, 0)),
            ],
            out_specs=pl.BlockSpec((1, 8, _CSP), lambda i, j: (i, 0, 0)),
        ),
        compiler_params=pltpu.CompilerParams(
            dimension_semantics=("parallel", "arbitrary"),
            vmem_limit_bytes=32 * 1024 * 1024),
        cost_estimate=conv_cost,
    )(patches, w_conv, b_conv)

    # ---- kernel 2: finish GAP + fused MLP head ----------------------------
    tn = 128 if n >= 128 else _round_up(n, 8)
    np_ = _round_up(n, tn)
    psums_p = jnp.pad(psums, ((0, np_ - n), (0, 0), (0, 0)))

    head_cost = pl.CostEstimate(
        flops=2 * np_ * (_CSP * f_out + f_out * f_mid + f_mid * _LP),
        transcendentals=0,
        bytes_accessed=int(psums_p.size * 4
                           + (w_bb.size + w1.size + w2.size + b_bb.size
                              + b1.size + b2.size + np_ * _LP) * 4))
    out = pl.pallas_call(
        functools.partial(_head_kernel, inv_s=1.0 / s),
        out_shape=jax.ShapeDtypeStruct((np_, _LP), jnp.float32),
        grid_spec=pltpu.PrefetchScalarGridSpec(
            num_scalar_prefetch=0,
            grid=(np_ // tn,),
            in_specs=[
                pl.BlockSpec((tn, 8, _CSP), lambda i: (i, 0, 0)),
                pl.BlockSpec((_CSP, f_out), lambda i: (0, 0)),
                pl.BlockSpec((1, f_out), lambda i: (0, 0)),
                pl.BlockSpec((f_out, f_mid), lambda i: (0, 0)),
                pl.BlockSpec((1, f_mid), lambda i: (0, 0)),
                pl.BlockSpec((f_mid, _LP), lambda i: (0, 0)),
                pl.BlockSpec((1, _LP), lambda i: (0, 0)),
            ],
            out_specs=pl.BlockSpec((tn, _LP), lambda i: (i, 0)),
        ),
        compiler_params=pltpu.CompilerParams(
            dimension_semantics=("parallel",),
            vmem_limit_bytes=32 * 1024 * 1024),
        cost_estimate=head_cost,
    )(psums_p, w_bb, b_bb, w1, b1, w2, b2)

    return out[:n, :latent_dim]


# ---------------------------------------------------------------------------
# Deterministic parameter init (PyTorch-style uniform(-1/sqrt(fan_in), ...))
# ---------------------------------------------------------------------------
def init_params(key, *, c_in=3, c_stem=32, features=512, f_size=256,
                latent_dimension=8):
    keys = jax.random.split(key, 8)

    def lin(kw_, kb_, fan_in, fan_out):
        bound = 1.0 / jnp.sqrt(fan_in)
        w = jax.random.uniform(kw_, (fan_in, fan_out), jnp.float32, -bound, bound)
        b = jax.random.uniform(kb_, (1, fan_out), jnp.float32, -bound, bound)
        return w, b

    w_conv, b_conv = lin(keys[0], keys[1], c_in * 3 * 3, c_stem)
    w_bb, b_bb = lin(keys[2], keys[3], c_stem, features)
    w1, b1 = lin(keys[4], keys[5], features, f_size)
    w2, b2 = lin(keys[6], keys[7], f_size, latent_dimension)
    return dict(w_conv=w_conv, b_conv=b_conv, w_bb=w_bb, b_bb=b_bb,
                w1=w1, b1=b1, w2=w2, b2=b2)


# ---------------------------------------------------------------------------
if __name__ == "__main__":
    key = jax.random.PRNGKey(0)
    k_x, k_p = jax.random.split(key)

    # Small, deterministic example input: batch=2, RGB, 16x16 (NCHW).
    x = jax.random.normal(k_x, (2, 3, 16, 16), dtype=jnp.bfloat16)
    params = init_params(k_p, latent_dimension=8)

    latent = encoder_forward(x, params)
    latent = jax.block_until_ready(latent)

    assert latent.shape == (2, 8), latent.shape
    assert latent.dtype == jnp.float32, latent.dtype
    print("KERNEL_OK")
</pallas_src>

<mosaic_0001>
module attributes {stable_mosaic.version = 11 : i64} {
  func.func @_conv_gap_kernel(%arg0: i32, %arg1: i32, %arg2: memref<1x64x32xbf16, #tpu.memory_space<vmem>>, %arg3: memref<32x128xbf16, #tpu.memory_space<vmem>>, %arg4: memref<1x128xf32, #tpu.memory_space<vmem>>, %arg5: memref<1x8x128xf32, #tpu.memory_space<vmem>>) attributes {dimension_semantics = [#tpu.dimension_semantics<parallel>, #tpu.dimension_semantics<arbitrary>], iteration_bounds = array<i64: 2, 1>, scalar_prefetch = 0 : i64, scratch_operands = 0 : i64, tpu.core_type = #tpu.core_type<tc>, window_params = [{transform_indices = @transform_0, window_bounds = array<i64: 1, 64, 32>}, {pipeline_mode = #tpu.pipeline_mode<synchronous>, transform_indices = @transform_1, window_bounds = array<i64: 32, 128>}, {pipeline_mode = #tpu.pipeline_mode<synchronous>, transform_indices = @transform_2, window_bounds = array<i64: 1, 128>}, {transform_indices = @transform_3, window_bounds = array<i64: 1, 8, 128>}]} {
    %c0_i32 = arith.constant 0 : i32
    %0 = arith.cmpi eq, %arg1, %c0_i32 : i32
    %1 = arith.extui %0 : i1 to i32
    %c0_i32_0 = arith.constant 0 : i32
    %2 = arith.cmpi ne, %1, %c0_i32_0 : i32
    scf.if %2 {
      %cst_17 = arith.constant 0.000000e+00 : f32
      %28 = vector.broadcast %cst_17 : f32 to vector<1x8x128xf32>
      %c0_18 = arith.constant 0 : index
      %c0_19 = arith.constant 0 : index
      %c0_20 = arith.constant 0 : index
      %29 = vector.load %arg5[%c0_18, %c0_19, %c0_20] : memref<1x8x128xf32, #tpu.memory_space<vmem>>, vector<1x8x128xf32>
      tpu.vector_store %arg5[%c0_18, %c0_19, %c0_20], %28 {strides = array<i32>} : memref<1x8x128xf32, #tpu.memory_space<vmem>>, vector<1x8x128xf32>,
    } else {
    }
    %c0 = arith.constant 0 : index
    %c0_1 = arith.constant 0 : index
    %c0_2 = arith.constant 0 : index
    %3 = vector.load %arg2[%c0, %c0_1, %c0_2] : memref<1x64x32xbf16, #tpu.memory_space<vmem>>, vector<1x64x32xbf16>
    %4 = vector.shape_cast %3 : vector<1x64x32xbf16> to vector<64x32xbf16>
    %c0_3 = arith.constant 0 : index
    %c0_4 = arith.constant 0 : index
    %5 = vector.load %arg3[%c0_3, %c0_4] : memref<32x128xbf16, #tpu.memory_space<vmem>>, vector<32x128xbf16>
    %cst = arith.constant dense<0.000000e+00> : vector<64x128xf32>
    %6 = tpu.matmul %4, %5, %cst {dimension_numbers = #tpu.dot_dimension_numbers<[1], [0], [0], [1], [0, 0, 1, 1], [], []>} : vector<64x32xbf16>, vector<32x128xbf16>, vector<64x128xf32> -> vector<64x128xf32>
    %c0_5 = arith.constant 0 : index
    %c0_6 = arith.constant 0 : index
    %7 = vector.load %arg4[%c0_5, %c0_6] : memref<1x128xf32, #tpu.memory_space<vmem>>, vector<1x128xf32>
    %8 = vector.broadcast %7 : vector<1x128xf32> to vector<64x128xf32>
    %9 = arith.addf %6, %8 : vector<64x128xf32>
    %cst_7 = arith.constant 0.000000e+00 : f32
    %10 = vector.broadcast %cst_7 : f32 to vector<64x128xf32>
    %11 = arith.maximumf %9, %10 : vector<64x128xf32>
    %12 = tpu.iota {dimensions = array<i32: 0>} : vector<64x1xi32>
    %c64_i32 = arith.constant 64 : i32
    %13 = arith.muli %arg1, %c64_i32 : i32
    %14 = vector.broadcast %13 : i32 to vector<64x1xi32>
    %15 = arith.addi %14, %12 : vector<64x1xi32>
    %c64_i32_8 = arith.constant 64 : i32
    %16 = vector.broadcast %c64_i32_8 : i32 to vector<64x1xi32>
    %17 = arith.cmpi slt, %15, %16 : vector<64x1xi32>
    %cst_9 = arith.constant 0.000000e+00 : f32
    %18 = vector.shape_cast %17 : vector<64x1xi1> to vector<64x1xi1>
    %19 = vector.broadcast %18 : vector<64x1xi1> to vector<64x128xi1>
    %20 = vector.broadcast %cst_9 : f32 to vector<64x128xf32>
    %21 = arith.select %19, %11, %20 : vector<64x128xi1>, vector<64x128xf32>
    %22 = vector.shape_cast %21 : vector<64x128xf32> to vector<8x8x128xf32>
    %cst_10 = arith.constant dense<0.000000e+00> : vector<8x128xf32>
    %23 = vector.multi_reduction <add>, %22, %cst_10 [0] : vector<8x8x128xf32> to vector<8x128xf32>
    %c0_11 = arith.constant 0 : index
    %c0_12 = arith.constant 0 : index
    %c0_13 = arith.constant 0 : index
    %24 = vector.load %arg5[%c0_11, %c0_12, %c0_13] : memref<1x8x128xf32, #tpu.memory_space<vmem>>, vector<1x8x128xf32>
    %25 = vector.shape_cast %23 : vector<8x128xf32> to vector<1x8x128xf32>
    %26 = arith.addf %24, %25 : vector<1x8x128xf32>
    %c0_14 = arith.constant 0 : index
    %c0_15 = arith.constant 0 : index
    %c0_16 = arith.constant 0 : index
    %27 = vector.load %arg5[%c0_14, %c0_15, %c0_16] : memref<1x8x128xf32, #tpu.memory_space<vmem>>, vector<1x8x128xf32>
    tpu.vector_store %arg5[%c0_14, %c0_15, %c0_16], %26 {strides = array<i32>} : memref<1x8x128xf32, #tpu.memory_space<vmem>>, vector<1x8x128xf32>,
    return
  }
  func.func @transform_0(%arg0: i32, %arg1: i32) -> (i32, i32, i32) {
    %c0_i32 = arith.constant 0 : i32
    %c0_i32_0 = arith.constant 0 : i32
    return %arg0, %arg1, %c0_i32 : i32, i32, i32
  }
  func.func @transform_1(%arg0: i32, %arg1: i32) -> (i32, i32) {
    %c0_i32 = arith.constant 0 : i32
    %c0_i32_0 = arith.constant 0 : i32
    %c0_i32_1 = arith.constant 0 : i32
    return %c0_i32, %c0_i32_0 : i32, i32
  }
  func.func @transform_2(%arg0: i32, %arg1: i32) -> (i32, i32) {
    %c0_i32 = arith.constant 0 : i32
    %c0_i32_0 = arith.constant 0 : i32
    %c0_i32_1 = arith.constant 0 : i32
    return %c0_i32, %c0_i32_0 : i32, i32
  }
  func.func @transform_3(%arg0: i32, %arg1: i32) -> (i32, i32, i32) {
    %c0_i32 = arith.constant 0 : i32
    %c0_i32_0 = arith.constant 0 : i32
    %c0_i32_1 = arith.constant 0 : i32
    return %arg0, %c0_i32, %c0_i32_0 : i32, i32, i32
  }
}

module attributes {stable_mosaic.version = 11 : i64} {
  func.func @_head_kernel(%arg0: i32, %arg1: memref<8x8x128xf32, #tpu.memory_space<vmem>>, %arg2: memref<128x512xf32, #tpu.memory_space<vmem>>, %arg3: memref<1x512xf32, #tpu.memory_space<vmem>>, %arg4: memref<512x256xf32, #tpu.memory_space<vmem>>, %arg5: memref<1x256xf32, #tpu.memory_space<vmem>>, %arg6: memref<256x128xf32, #tpu.memory_space<vmem>>, %arg7: memref<1x128xf32, #tpu.memory_space<vmem>>, %arg8: memref<8x128xf32, #tpu.memory_space<vmem>>) attributes {dimension_semantics = [#tpu.dimension_semantics<parallel>], iteration_bounds = array<i64: 1>, scalar_prefetch = 0 : i64, scratch_operands = 0 : i64, tpu.core_type = #tpu.core_type<tc>, window_params = [{transform_indices = @transform_0, window_bounds = array<i64: 8, 8, 128>}, {pipeline_mode = #tpu.pipeline_mode<synchronous>, transform_indices = @transform_1, window_bounds = array<i64: 128, 512>}, {pipeline_mode = #tpu.pipeline_mode<synchronous>, transform_indices = @transform_2, window_bounds = array<i64: 1, 512>}, {pipeline_mode = #tpu.pipeline_mode<synchronous>, transform_indices = @transform_3, window_bounds = array<i64: 512, 256>}, {pipeline_mode = #tpu.pipeline_mode<synchronous>, transform_indices = @transform_4, window_bounds = array<i64: 1, 256>}, {pipeline_mode = #tpu.pipeline_mode<synchronous>, transform_indices = @transform_5, window_bounds = array<i64: 256, 128>}, {pipeline_mode = #tpu.pipeline_mode<synchronous>, transform_indices = @transform_6, window_bounds = array<i64: 1, 128>}, {transform_indices = @transform_7, window_bounds = array<i64: 8, 128>}]} {
    %c0 = arith.constant 0 : index
    %c0_0 = arith.constant 0 : index
    %c0_1 = arith.constant 0 : index
    %0 = vector.load %arg1[%c0, %c0_0, %c0_1] : memref<8x8x128xf32, #tpu.memory_space<vmem>>, vector<8x8x128xf32>
    %cst = arith.constant dense<0.000000e+00> : vector<8x128xf32>
    %1 = vector.multi_reduction <add>, %0, %cst [1] : vector<8x8x128xf32> to vector<8x128xf32>
    %cst_2 = arith.constant 1.562500e-02 : f32
    %2 = vector.broadcast %cst_2 : f32 to vector<8x128xf32>
    %3 = arith.mulf %1, %2 : vector<8x128xf32>
    %c0_3 = arith.constant 0 : index
    %c0_4 = arith.constant 0 : index
    %4 = vector.load %arg2[%c0_3, %c0_4] : memref<128x512xf32, #tpu.memory_space<vmem>>, vector<128x512xf32>
    %cst_5 = arith.constant dense<0.000000e+00> : vector<8x512xf32>
    %5 = tpu.matmul %3, %4, %cst_5 {dimension_numbers = #tpu.dot_dimension_numbers<[1], [0], [0], [1], [0, 0, 1, 1], [], []>} : vector<8x128xf32>, vector<128x512xf32>, vector<8x512xf32> -> vector<8x512xf32>
    %c0_6 = arith.constant 0 : index
    %c0_7 = arith.constant 0 : index
    %6 = vector.load %arg3[%c0_6, %c0_7] : memref<1x512xf32, #tpu.memory_space<vmem>>, vector<1x512xf32>
    %7 = vector.broadcast %6 : vector<1x512xf32> to vector<8x512xf32>
    %8 = arith.addf %5, %7 : vector<8x512xf32>
    %cst_8 = arith.constant 0.000000e+00 : f32
    %9 = vector.broadcast %cst_8 : f32 to vector<8x512xf32>
    %10 = arith.maximumf %8, %9 : vector<8x512xf32>
    %c0_9 = arith.constant 0 : index
    %c0_10 = arith.constant 0 : index
    %11 = vector.load %arg4[%c0_9, %c0_10] : memref<512x256xf32, #tpu.memory_space<vmem>>, vector<512x256xf32>
    %cst_11 = arith.constant dense<0.000000e+00> : vector<8x256xf32>
    %12 = tpu.matmul %10, %11, %cst_11 {dimension_numbers = #tpu.dot_dimension_numbers<[1], [0], [0], [1], [0, 0, 1, 1], [], []>} : vector<8x512xf32>, vector<512x256xf32>, vector<8x256xf32> -> vector<8x256xf32>
    %c0_12 = arith.constant 0 : index
    %c0_13 = arith.constant 0 : index
    %13 = vector.load %arg5[%c0_12, %c0_13] : memref<1x256xf32, #tpu.memory_space<vmem>>, vector<1x256xf32>
    %14 = vector.broadcast %13 : vector<1x256xf32> to vector<8x256xf32>
    %15 = arith.addf %12, %14 : vector<8x256xf32>
    %cst_14 = arith.constant 0.000000e+00 : f32
    %16 = vector.broadcast %cst_14 : f32 to vector<8x256xf32>
    %17 = arith.maximumf %15, %16 : vector<8x256xf32>
    %c0_15 = arith.constant 0 : index
    %c0_16 = arith.constant 0 : index
    %18 = vector.load %arg6[%c0_15, %c0_16] : memref<256x128xf32, #tpu.memory_space<vmem>>, vector<256x128xf32>
    %cst_17 = arith.constant dense<0.000000e+00> : vector<8x128xf32>
    %19 = tpu.matmul %17, %18, %cst_17 {dimension_numbers = #tpu.dot_dimension_numbers<[1], [0], [0], [1], [0, 0, 1, 1], [], []>} : vector<8x256xf32>, vector<256x128xf32>, vector<8x128xf32> -> vector<8x128xf32>
    %c0_18 = arith.constant 0 : index
    %c0_19 = arith.constant 0 : index
    %20 = vector.load %arg7[%c0_18, %c0_19] : memref<1x128xf32, #tpu.memory_space<vmem>>, vector<1x128xf32>
    %21 = vector.broadcast %20 : vector<1x128xf32> to vector<8x128xf32>
    %22 = arith.addf %19, %21 : vector<8x128xf32>
    %c0_20 = arith.constant 0 : index
    %c0_21 = arith.constant 0 : index
    %23 = vector.load %arg8[%c0_20, %c0_21] : memref<8x128xf32, #tpu.memory_space<vmem>>, vector<8x128xf32>
    tpu.vector_store %arg8[%c0_20, %c0_21], %22 {strides = array<i32>} : memref<8x128xf32, #tpu.memory_space<vmem>>, vector<8x128xf32>,
    return
  }
  func.func @transform_0(%arg0: i32) -> (i32, i32, i32) {
    %c0_i32 = arith.constant 0 : i32
    %c0_i32_0 = arith.constant 0 : i32
    %c0_i32_1 = arith.constant 0 : i32
    return %arg0, %c0_i32, %c0_i32_0 : i32, i32, i32
  }
  func.func @transform_1(%arg0: i32) -> (i32, i32) {
    %c0_i32 = arith.constant 0 : i32
    %c0_i32_0 = arith.constant 0 : i32
    %c0_i32_1 = arith.constant 0 : i32
    return %c0_i32, %c0_i32_0 : i32, i32
  }
  func.func @transform_2(%arg0: i32) -> (i32, i32) {
    %c0_i32 = arith.constant 0 : i32
    %c0_i32_0 = arith.constant 0 : i32
    %c0_i32_1 = arith.constant 0 : i32
    return %c0_i32, %c0_i32_0 : i32, i32
  }
  func.func @transform_3(%arg0: i32) -> (i32, i32) {
    %c0_i32 = arith.constant 0 : i32
    %c0_i32_0 = arith.constant 0 : i32
    %c0_i32_1 = arith.constant 0 : i32
    return %c0_i32, %c0_i32_0 : i32, i32
  }
  func.func @transform_4(%arg0: i32) -> (i32, i32) {
    %c0_i32 = arith.constant 0 : i32
    %c0_i32_0 = arith.constant 0 : i32
    %c0_i32_1 = arith.constant 0 : i32
    return %c0_i32, %c0_i32_0 : i32, i32
  }
  func.func @transform_5(%arg0: i32) -> (i32, i32) {
    %c0_i32 = arith.constant 0 : i32
    %c0_i32_0 = arith.constant 0 : i32
    %c0_i32_1 = arith.constant 0 : i32
    return %c0_i32, %c0_i32_0 : i32, i32
  }
  func.func @transform_6(%arg0: i32) -> (i32, i32) {
    %c0_i32 = arith.constant 0 : i32
    %c0_i32_0 = arith.constant 0 : i32
    %c0_i32_1 = arith.constant 0 : i32
    return %c0_i32, %c0_i32_0 : i32, i32
  }
  func.func @transform_7(%arg0: i32) -> (i32, i32) {
    %c0_i32 = arith.constant 0 : i32
    %c0_i32_0 = arith.constant 0 : i32
    return %arg0, %c0_i32 : i32, i32
  }
}

</mosaic_0001>

<bundles_post_ra>
// kernel: encoder_forward.2
= control target key start
LH: loop header
LB: loop body
LE: loop exit
PB: predicated region body
PF: predicated region fallthrough
CT: control target
= control target key end

     0   :  { %s550_s12 = smov 0   ;;  %s552_s13 = smov 0   ;;  %s596_s0 = inlined_call_operand.vmem [shape: bf16[2,64,32], index: 0, kind: input, shape index: {}]   ;;  %s597_s1 = inlined_call_operand.vmem [shape: bf16[32,128], index: 1, kind: input, shape index: {}]   ;;  %s598_s2 = inlined_call_operand.vmem [shape: f32[1,128], index: 2, kind: input, shape index: {}]   ;;  %s599_s3 = inlined_call_operand.vmem [shape: f32[2,8,128], index: 3, kind: output, shape index: {}]  }
   0x1   :  { %s554_s14 = smov 0  }
   0x2 LB: > { %s25_s15 = sadd.s32 1, %s524_s13  ;;  %p433_p0 = scmp.ge.s32.totalorder %s528_s14, 1  ;;  %s528_s14 = sphi %s554_s14, %s13_s14   ;;  %s524_s13 = sphi %s552_s13, %s601_s13   ;;  %s520_s12 = sphi %s550_s12, %s600_s12  }
   0x3   : > { %p27_p1 = scmp.ge.s32.totalorder %s25_s15, 2  ;;  %p156_p2 = scmp.lt.s32.totalorder %s528_s14, 3 }
   0x5   : > { %s603_s15 = smov (%p27_p1, %s25_s15), 0  ;;  %p157_p3 = pnand %p433_p0, %p156_p2 }
   0x6   : > { %p184_p4 = scmp.lt.s32.totalorder (!%p157_p3), %s520_s12, 1 }
   0x7   : > { %160 = sbr.rel (%p157_p3) target bundleno = 173 (0xad), region = 32 }
   0xc   : > { %v473_v0 = vld [vmem:[%s597_s1 + $0x8] sm:$0xff]  ;;  %v472_v1 = vld [vmem:[%s597_s1] sm:$0xff]  ;;  %s605_s12 = smov (!%p184_p4, %s520_s12), 1  ;;  %vm251_vm0 = vcmask 261120  }
   0xd   : > { %270 = vmatpush.bf16.msra.mxu0 %v473_v0  ;;  %474 = vmatpush.bf16.msra.mxu1 %v473_v0  ;;  %s467_s20 = sshll.u32 %s605_s12, 5  ;;  %v505_v8 = vld [vmem:[%s598_s2] ss:$0 sm:$0xff]  ;;  %s436_s26 = sshll.u32 %s605_s12, 3 }
   0xe   : > { %475 = vmatpush.bf16.msra.mxu2 %v473_v0  ;;  %476 = vmatpush.bf16.msra.mxu3 %v473_v0  ;;  %s191_s23 = scalar_lea.vmem %s596_s0, %s467_s20  ;;  %s196_s29 = scalar_lea.vmem %s599_s3, %s436_s26 }
   0xf   : > { %v468_v2 = vld [vmem:[%s191_s23] sm:$0xff]  ;;  %v469_v3 = vld [vmem:[%s191_s23 + $0x8] sm:$0xff]  ;;  %v470_v4 = vld [vmem:[%s191_s23 + $0x10] sm:$0xff] }
  0x10   : > { %v471_v5 = vld [vmem:[%s191_s23 + $0x18] sm:$0xff] }
  0x11   : > { %271 = vmatpush.bf16.msra.mxu0 %v472_v1  ;;  %477 = vmatpush.bf16.msra.mxu1 %v472_v1 }
  0x12   : > { %478 = vmatpush.bf16.msra.mxu2 %v472_v1  ;;  %479 = vmatpush.bf16.msra.mxu3 %v472_v1 }
  0x14   : > { %461 = vmatmul.msk.bf16.vlgmr.msra.gmra.mxu0 %vm251_vm0, %v468_v2  ;;  %462 = vmatmul.msk.bf16.vlgmr.msra.gmra.mxu1 %vm251_vm0, %v469_v3 }
  0x15   : > { %463 = vmatmul.msk.bf16.vlgmr.msra.gmra.mxu2 %vm251_vm0, %v470_v4  ;;  %464 = vmatmul.msk.bf16.vlgmr.msra.gmra.mxu3 %vm251_vm0, %v471_v5 }
  0x91   : > { %v273_v6 = vpop.f32.mrf.mxu0  ;;  %v278_v7 = vpop.f32.mrf.mxu1 }
  0x92   : > { %v274_v9 = vadd.f32 %v505_v8, %v273_v6  ;;  %v279_v14 = vadd.f32 %v505_v8, %v278_v7 }
  0x94   : > { %v293_v16 = vmax.f32 %v274_v9, 0.0  ;;  %v295_v19 = vmax.f32 %v279_v14, 0.0 }
  0x98   : > { %v283_v10 = vpop.f32.mrf.mxu2  ;;  %v288_v11 = vpop.f32.mrf.mxu3 }
  0x99   : > { %v275_v12 = vpop.f32.mrf.mxu0  ;;  %v280_v13 = vpop.f32.mrf.mxu1  ;;  %v284_v20 = vadd.f32 %v505_v8, %v283_v10  ;;  %v289_v28 = vadd.f32 %v505_v8, %v288_v11 }
  0x9a   : > { %v276_v15 = vadd.f32 %v505_v8, %v275_v12  ;;  %v281_v18 = vadd.f32 %v505_v8, %v280_v13 }
  0x9b   : > { %v297_v27 = vmax.f32 %v284_v20, 0.0  ;;  %v299_v33 = vmax.f32 %v289_v28, 0.0 }
  0x9c   : > { %v294_v17 = vmax.f32 %v276_v15, 0.0  ;;  %v296_v22 = vmax.f32 %v281_v18, 0.0 }
  0x9e   : > { %v352_v21 = vadd.f32 %v294_v17, %v293_v16 }
  0xa0   : > { %v353_v23 = vadd.f32 %v352_v21, %v295_v19  ;;  %v285_v24 = vpop.f32.mrf.mxu2  ;;  %v290_v26 = vpop.f32.mrf.mxu3 }
  0xa1   : > { %v286_v25 = vadd.f32 %v505_v8, %v285_v24  ;;  %v291_v32 = vadd.f32 %v505_v8, %v290_v26 }
  0xa2   : > { %v354_v29 = vadd.f32 %v353_v23, %v296_v22 }
  0xa3   : > { %v298_v30 = vmax.f32 %v286_v25, 0.0  ;;  %v300_v35 = vmax.f32 %v291_v32, 0.0 }
  0xa4   : > { %v355_v31 = vadd.f32 %v354_v29, %v297_v27 }
  0xa6   : > { %v356_v34 = vadd.f32 %v355_v31, %v298_v30 }
  0xa8   : > { %v357_v36 = vadd.f32 %v356_v34, %v299_v33 }
  0xaa   : > { %v358_v37 = vadd.f32 %v357_v36, %v300_v35 }
  0xac   : > { %361 = vst [vmem:[%s196_s29] sm:$0xff] %v358_v37 }
  0xad PF: > { %s13_s14 = sadd.s32 1, %s528_s14   ;;  %s600_s12 = smov %s524_s13 }
  0xae   : > { %p10_p5 = scmp.ge.s32.totalorder %s13_s14, 4   ;;  %s601_s13 = smov %s603_s15 }
  0xb0   :  { %12 = sbr.rel (!%p10_p5) target bundleno = 2 (0x2), region = 66 }

// kernel: encoder_forward.3
= control target key start
LH: loop header
LB: loop body
LE: loop exit
PB: predicated region body
PF: predicated region fallthrough
CT: control target
= control target key end

     0   :  { %vm172_vm0 = vcmask 1041409   ;;  %vm174_vm1 = vcmask 1042434   ;;  %vm176_vm2 = vcmask 1043459   ;;  %vm178_vm3 = vcmask 1044484   ;;  %s1402_s1 = inlined_call_operand.vmem [shape: f32[128,512], index: 1, kind: input, shape index: {}]   ;;  %s1403_s0 = inlined_call_operand.vmem [shape: f32[8,8,128], index: 0, kind: input, shape index: {}]   ;;  %s1404_s3 = inlined_call_operand.vmem [shape: f32[512,256], index: 3, kind: input, shape index: {}]   ;;  %s1405_s2 = inlined_call_operand.vmem [shape: f32[1,512], index: 2, kind: input, shape index: {}]   ;;  %s1406_s5 = inlined_call_operand.vmem [shape: f32[256,128], index: 5, kind: input, shape index: {}]   ;;  %s1407_s6 = inlined_call_operand.vmem [shape: f32[1,128], index: 6, kind: input, shape index: {}]   ;;  %s1408_s4 = inlined_call_operand.vmem [shape: f32[1,256], index: 4, kind: input, shape index: {}]   ;;  %s1409_s7 = inlined_call_operand.vmem [shape: f32[8,128], index: 7, kind: output, shape index: {}]  }
   0x1   :  { %v150_v0 = vld [vmem:[%s1402_s1 + $0x1e0] sm:$0xff]  ;;  %v152_v1 = vld [vmem:[%s1402_s1 + $0x1f0] sm:$0xff]  ;;  %v153_v2 = vld [vmem:[%s1402_s1 + $0x1f8] sm:$0xff]  ;;  %vm180_vm4 = vcmask 1045509   ;;  %vm182_vm5 = vcmask 1046534   ;;  %vm184_vm6 = vcmask 1047559  }
   0x2   :  { %187 = vmatpush.msra.mxu0 %v150_v0  ;;  %227 = vmatpush.msra.mxu2 %v152_v1  ;;  %v146_v3 = vld [vmem:[%s1402_s1 + $0x1c0] sm:$0xff]  ;;  %v151_v4 = vld [vmem:[%s1402_s1 + $0x1e8] sm:$0xff]  ;;  %v148_v5 = vld [vmem:[%s1402_s1 + $0x1d0] sm:$0xff] }
   0x3   :  { %247 = vmatpush.msra.mxu3 %v153_v2  ;;  %207 = vmatpush.msra.mxu1 %v151_v4  ;;  %v149_v6 = vld [vmem:[%s1402_s1 + $0x1d8] sm:$0xff]  ;;  %v142_v7 = vld [vmem:[%s1402_s1 + $0x1a0] sm:$0xff]  ;;  %v147_v8 = vld [vmem:[%s1402_s1 + $0x1c8] sm:$0xff] }
   0x4   :  { %188 = vmatpush.msra.mxu0 %v146_v3  ;;  %228 = vmatpush.msra.mxu2 %v148_v5  ;;  %v144_v9 = vld [vmem:[%s1402_s1 + $0x1b0] sm:$0xff]  ;;  %v145_v10 = vld [vmem:[%s1402_s1 + $0x1b8] sm:$0xff]  ;;  %v138_v11 = vld [vmem:[%s1402_s1 + $0x180] sm:$0xff] }
   0x5   :  { %248 = vmatpush.msra.mxu3 %v149_v6  ;;  %208 = vmatpush.msra.mxu1 %v147_v8  ;;  %v143_v12 = vld [vmem:[%s1402_s1 + $0x1a8] sm:$0xff]  ;;  %v140_v13 = vld [vmem:[%s1402_s1 + $0x190] sm:$0xff]  ;;  %v141_v14 = vld [vmem:[%s1402_s1 + $0x198] sm:$0xff] }
   0x6   :  { %189 = vmatpush.msra.mxu0 %v142_v7  ;;  %229 = vmatpush.msra.mxu2 %v144_v9  ;;  %v139_v15 = vld [vmem:[%s1402_s1 + $0x188] sm:$0xff]  ;;  %v134_v16 = vld [vmem:[%s1402_s1 + $0x160] sm:$0xff]  ;;  %v136_v17 = vld [vmem:[%s1402_s1 + $0x170] sm:$0xff] }
   0x7   :  { %249 = vmatpush.msra.mxu3 %v145_v10  ;;  %209 = vmatpush.msra.mxu1 %v143_v12  ;;  %v137_v18 = vld [vmem:[%s1402_s1 + $0x178] sm:$0xff]  ;;  %v135_v19 = vld [vmem:[%s1402_s1 + $0x168] sm:$0xff]  ;;  %v130_v20 = vld [vmem:[%s1402_s1 + $0x140] sm:$0xff] }
   0x8   :  { %190 = vmatpush.msra.mxu0 %v138_v11  ;;  %230 = vmatpush.msra.mxu2 %v140_v13  ;;  %v132_v21 = vld [vmem:[%s1402_s1 + $0x150] sm:$0xff]  ;;  %v133_v22 = vld [vmem:[%s1402_s1 + $0x158] sm:$0xff]  ;;  %v131_v23 = vld [vmem:[%s1402_s1 + $0x148] sm:$0xff] }
   0x9   :  { %250 = vmatpush.msra.mxu3 %v141_v14  ;;  %210 = vmatpush.msra.mxu1 %v139_v15  ;;  %v126_v24 = vld [vmem:[%s1402_s1 + $0x120] sm:$0xff]  ;;  %v128_v25 = vld [vmem:[%s1402_s1 + $0x130] sm:$0xff]  ;;  %v129_v26 = vld [vmem:[%s1402_s1 + $0x138] sm:$0xff] }
   0xa   :  { %191 = vmatpush.msra.mxu0 %v134_v16  ;;  %231 = vmatpush.msra.mxu2 %v136_v17  ;;  %v127_v27 = vld [vmem:[%s1402_s1 + $0x128] sm:$0xff]  ;;  %v122_v28 = vld [vmem:[%s1402_s1 + $0x100] sm:$0xff]  ;;  %v124_v29 = vld [vmem:[%s1402_s1 + $0x110] sm:$0xff] }
   0xb   :  { %251 = vmatpush.msra.mxu3 %v137_v18  ;;  %211 = vmatpush.msra.mxu1 %v135_v19  ;;  %v125_v30 = vld [vmem:[%s1402_s1 + $0x118] sm:$0xff]  ;;  %v123_v31 = vld [vmem:[%s1402_s1 + $0x108] sm:$0xff]  ;;  %v118_v32 = vld [vmem:[%s1402_s1 + $0xe0] sm:$0xff] }
   0xc   :  { %192 = vmatpush.msra.mxu0 %v130_v20  ;;  %232 = vmatpush.msra.mxu2 %v132_v21  ;;  %v120_v33 = vld [vmem:[%s1402_s1 + $0xf0] sm:$0xff]  ;;  %v121_v34 = vld [vmem:[%s1402_s1 + $0xf8] sm:$0xff]  ;;  %v119_v35 = vld [vmem:[%s1402_s1 + $0xe8] sm:$0xff] }
   0xd   :  { %252 = vmatpush.msra.mxu3 %v133_v22  ;;  %212 = vmatpush.msra.mxu1 %v131_v23  ;;  %v114_v36 = vld [vmem:[%s1402_s1 + $0xc0] sm:$0xff]  ;;  %v116_v37 = vld [vmem:[%s1402_s1 + $0xd0] sm:$0xff]  ;;  %v117_v38 = vld [vmem:[%s1402_s1 + $0xd8] sm:$0xff] }
   0xe   :  { %193 = vmatpush.msra.mxu0 %v126_v24  ;;  %233 = vmatpush.msra.mxu2 %v128_v25  ;;  %v110_v39 = vld [vmem:[%s1402_s1 + $0xa0] sm:$0xff]  ;;  %v115_v40 = vld [vmem:[%s1402_s1 + $0xc8] sm:$0xff]  ;;  %v112_v41 = vld [vmem:[%s1402_s1 + $0xb0] sm:$0xff] }
   0xf   :  { %253 = vmatpush.msra.mxu3 %v129_v26  ;;  %213 = vmatpush.msra.mxu1 %v127_v27  ;;  %v113_v42 = vld [vmem:[%s1402_s1 + $0xb8] sm:$0xff]  ;;  %v106_v43 = vld [vmem:[%s1402_s1 + $0x80] sm:$0xff]  ;;  %v111_v44 = vld [vmem:[%s1402_s1 + $0xa8] sm:$0xff] }
  0x10   :  { %194 = vmatpush.msra.mxu0 %v122_v28  ;;  %234 = vmatpush.msra.mxu2 %v124_v29  ;;  %v108_v45 = vld [vmem:[%s1402_s1 + $0x90] sm:$0xff]  ;;  %v109_v46 = vld [vmem:[%s1402_s1 + $0x98] sm:$0xff]  ;;  %v102_v47 = vld [vmem:[%s1402_s1 + $0x60] sm:$0xff] }
  0x11   :  { %254 = vmatpush.msra.mxu3 %v125_v30  ;;  %214 = vmatpush.msra.mxu1 %v123_v31  ;;  %v107_v48 = vld [vmem:[%s1402_s1 + $0x88] sm:$0xff]  ;;  %v104_v49 = vld [vmem:[%s1402_s1 + $0x70] sm:$0xff]  ;;  %v105_v50 = vld [vmem:[%s1402_s1 + $0x78] sm:$0xff] }
  0x12   :  { %195 = vmatpush.msra.mxu0 %v118_v32  ;;  %235 = vmatpush.msra.mxu2 %v120_v33  ;;  %v26_v51 = vld [vmem:[%s1403_s0] sm:$0xff]  ;;  %v27_v52 = vld [vmem:[%s1403_s0 + $0x8] sm:$0xff]  ;;  %v28_v53 = vld [vmem:[%s1403_s0 + $0x10] sm:$0xff] }
  0x13   :  { %255 = vmatpush.msra.mxu3 %v121_v34  ;;  %215 = vmatpush.msra.mxu1 %v119_v35  ;;  %v29_v54 = vld [vmem:[%s1403_s0 + $0x18] sm:$0xff]  ;;  %v30_v55 = vld [vmem:[%s1403_s0 + $0x20] sm:$0xff]  ;;  %v31_v56 = vld [vmem:[%s1403_s0 + $0x28] sm:$0xff]  ;;  %v34_v57 = vrot.slane %v26_v51, 4  ;;  %v40_v58 = vrot.slane %v27_v52, 4  ;;  %v46_v59 = vrot.slane %v28_v53, 4 }
  0x14   :  { %196 = vmatpush.msra.mxu0 %v114_v36  ;;  %236 = vmatpush.msra.mxu2 %v116_v37  ;;  %v103_v60 = vld [vmem:[%s1402_s1 + $0x68] sm:$0xff]  ;;  %v32_v61 = vld [vmem:[%s1403_s0 + $0x30] sm:$0xff]  ;;  %v33_v62 = vld [vmem:[%s1403_s0 + $0x38] sm:$0xff]  ;;  %v52_v63 = vrot.slane %v29_v54, 4  ;;  %v58_v0 = vrot.slane %v30_v55, 4  ;;  %v64_v1 = vrot.slane %v31_v56, 4 }
  0x15   :  { %256 = vmatpush.msra.mxu3 %v117_v38  ;;  %216 = vmatpush.msra.mxu1 %v115_v40  ;;  %v98_v2 = vld [vmem:[%s1402_s1 + $0x40] sm:$0xff]  ;;  %v100_v3 = vld [vmem:[%s1402_s1 + $0x50] sm:$0xff]  ;;  %v35_v4 = vadd.f32 %v34_v57, %v26_v51  ;;  %v41_v5 = vadd.f32 %v40_v58, %v27_v52  ;;  %v47_v6 = vadd.f32 %v46_v59, %v28_v53  ;;  %v70_v7 = vrot.slane %v32_v61, 4  ;;  %v101_v8 = vld [vmem:[%s1402_s1 + $0x58] sm:$0xff] }
  0x16   :  { %197 = vmatpush.msra.mxu0 %v110_v39  ;;  %237 = vmatpush.msra.mxu2 %v112_v41  ;;  %v99_v9 = vld [vmem:[%s1402_s1 + $0x48] sm:$0xff]  ;;  %v53_v10 = vadd.f32 %v52_v63, %v29_v54  ;;  %v59_v11 = vadd.f32 %v58_v0, %v30_v55  ;;  %v65_v12 = vadd.f32 %v64_v1, %v31_v56  ;;  %v76_v13 = vrot.slane %v33_v62, 4  ;;  %v94_v14 = vld [vmem:[%s1402_s1 + $0x20] sm:$0xff]  ;;  %v96_v15 = vld [vmem:[%s1402_s1 + $0x30] sm:$0xff] }
  0x17   :  { %257 = vmatpush.msra.mxu3 %v113_v42  ;;  %217 = vmatpush.msra.mxu1 %v111_v44  ;;  %v36_v16 = vrot.slane %v35_v4, 2  ;;  %v42_v17 = vrot.slane %v41_v5, 2  ;;  %v48_v18 = vrot.slane %v47_v6, 2  ;;  %v71_v19 = vadd.f32 %v70_v7, %v32_v61  ;;  %v97_v20 = vld [vmem:[%s1402_s1 + $0x38] sm:$0xff]  ;;  %v95_v21 = vld [vmem:[%s1402_s1 + $0x28] sm:$0xff]  ;;  %v90_v26 = vld [vmem:[%s1402_s1] sm:$0xff] }
  0x18   :  { %198 = vmatpush.msra.mxu0 %v106_v43  ;;  %238 = vmatpush.msra.mxu2 %v108_v45  ;;  %v54_v22 = vrot.slane %v53_v10, 2  ;;  %v60_v23 = vrot.slane %v59_v11, 2  ;;  %v66_v24 = vrot.slane %v65_v12, 2  ;;  %v77_v25 = vadd.f32 %v76_v13, %v33_v62  ;;  %v92_v27 = vld [vmem:[%s1402_s1 + $0x10] sm:$0xff]  ;;  %v93_v32 = vld [vmem:[%s1402_s1 + $0x18] sm:$0xff]  ;;  %v91_v37 = vld [vmem:[%s1402_s1 + $0x8] sm:$0xff] }
  0x19   :  { %258 = vmatpush.msra.mxu3 %v109_v46  ;;  %218 = vmatpush.msra.mxu1 %v107_v48  ;;  %v37_v28 = vadd.f32 %v36_v16, %v35_v4  ;;  %v43_v29 = vadd.f32 %v42_v17, %v41_v5  ;;  %v49_v30 = vadd.f32 %v48_v18, %v47_v6  ;;  %v72_v31 = vrot.slane %v71_v19, 2  ;;  %v301_v42 = vld [vmem:[%s1404_s3 + $0xf0] sm:$0xff]  ;;  %v299_v54 = vld [vmem:[%s1404_s3 + $0xe0] sm:$0xff] }
  0x1a   :  { %199 = vmatpush.msra.mxu0 %v102_v47  ;;  %239 = vmatpush.msra.mxu2 %v104_v49  ;;  %v55_v33 = vadd.f32 %v54_v22, %v53_v10  ;;  %v61_v34 = vadd.f32 %v60_v23, %v59_v11  ;;  %v67_v35 = vadd.f32 %v66_v24, %v65_v12  ;;  %v78_v36 = vrot.slane %v77_v25, 2  ;;  %v333_v43 = vld [vmem:[%s1404_s3 + $0x1f0] sm:$0xff]  ;;  %v331_v55 = vld [vmem:[%s1404_s3 + $0x1e0] sm:$0xff] }
  0x1b   :  { %259 = vmatpush.msra.mxu3 %v105_v50  ;;  %219 = vmatpush.msra.mxu1 %v103_v60  ;;  %v38_v38 = vrot.slane %v37_v28, 1  ;;  %v44_v39 = vrot.slane %v43_v29, 1  ;;  %v50_v40 = vrot.slane %v49_v30, 1  ;;  %v73_v41 = vadd.f32 %v72_v31, %v71_v19  ;;  %v365_v48 = vld [vmem:[%s1404_s3 + $0x2f0] sm:$0xff]  ;;  %v363_v60 = vld [vmem:[%s1404_s3 + $0x2e0] sm:$0xff] }
  0x1c   :  { %200 = vmatpush.msra.mxu0 %v98_v2  ;;  %240 = vmatpush.msra.mxu2 %v100_v3  ;;  %v56_v44 = vrot.slane %v55_v33, 1  ;;  %v62_v45 = vrot.slane %v61_v34, 1  ;;  %v68_v46 = vrot.slane %v67_v35, 1  ;;  %v79_v47 = vadd.f32 %v78_v36, %v77_v25  ;;  %v397_v49 = vld [vmem:[%s1404_s3 + $0x3f0] sm:$0xff]  ;;  %v395_v61 = vld [vmem:[%s1404_s3 + $0x3e0] sm:$0xff] }
  0x1d   :  { %260 = vmatpush.msra.mxu3 %v101_v8  ;;  %220 = vmatpush.msra.mxu1 %v99_v9  ;;  %v39_v50 = vadd.f32 %v38_v38, %v37_v28  ;;  %v45_v51 = vadd.f32 %v44_v39, %v43_v29  ;;  %v51_v52 = vadd.f32 %v50_v40, %v49_v30  ;;  %v74_v53 = vrot.slane %v73_v41, 1  ;;  %v297_v2 = vld [vmem:[%s1404_s3 + $0xd0] sm:$0xff]  ;;  %v295_v11 = vld [vmem:[%s1404_s3 + $0xc0] sm:$0xff] }
  0x1e   :  { %201 = vmatpush.msra.mxu0 %v94_v14  ;;  %241 = vmatpush.msra.mxu2 %v96_v15  ;;  %v57_v56 = vadd.f32 %v56_v44, %v55_v33  ;;  %v63_v57 = vadd.f32 %v62_v45, %v61_v34  ;;  %v69_v58 = vadd.f32 %v68_v46, %v67_v35  ;;  %v80_v59 = vrot.slane %v79_v47, 1  ;;  %v329_v3 = vld [vmem:[%s1404_s3 + $0x1d0] sm:$0xff]  ;;  %v327_v12 = vld [vmem:[%s1404_s3 + $0x1c0] sm:$0xff] }
  0x1f   :  { %261 = vmatpush.msra.mxu3 %v97_v20  ;;  %221 = vmatpush.msra.mxu1 %v95_v21  ;;  %v75_v62 = vadd.f32 %v74_v53, %v73_v41  ;;  %v82_v63 = vmul.f32 0.015625, %v39_v50  ;;  %v83_v0 = vmul.f32 0.015625, %v45_v51  ;;  %v84_v1 = vmul.f32 0.015625, %v51_v52  ;;  %v361_v7 = vld [vmem:[%s1404_s3 + $0x2d0] sm:$0xff]  ;;  %v359_v15 = vld [vmem:[%s1404_s3 + $0x2c0] sm:$0xff] }
  0x20   :  { %202 = vmatpush.msra.mxu0 %v90_v26  ;;  %242 = vmatpush.msra.mxu2 %v92_v27  ;;  %v81_v4 = vadd.f32 %v80_v59, %v79_v47  ;;  %v85_v5 = vmul.f32 0.015625, %v57_v56  ;;  %v86_v6 = vmul.f32 0.015625, %v63_v57  ;;  %v393_v8 = vld [vmem:[%s1404_s3 + $0x3d0] sm:$0xff]  ;;  %v87_v9 = vmul.f32 0.015625, %v69_v58  ;;  %v391_v16 = vld [vmem:[%s1404_s3 + $0x3c0] sm:$0xff] }
  0x21   :  { %262 = vmatpush.msra.mxu3 %v93_v32  ;;  %222 = vmatpush.msra.mxu1 %v91_v37  ;;  %v173_v10 = vsel %vm172_vm0, %v83_v0, %v82_v63  ;;  %v88_v13 = vmul.f32 0.015625, %v75_v62  ;;  %v293_v19 = vld [vmem:[%s1404_s3 + $0xb0] sm:$0xff]  ;;  %v291_v27 = vld [vmem:[%s1404_s3 + $0xa0] sm:$0xff] }
  0x22   :  { %405 = vmatpush.msrb.mxu0 %v301_v42  ;;  %445 = vmatpush.msrb.mxu2 %v365_v48  ;;  %v175_v14 = vsel %vm174_vm1, %v84_v1, %v173_v10  ;;  %v89_v17 = vmul.f32 0.015625, %v81_v4  ;;  %v325_v20 = vld [vmem:[%s1404_s3 + $0x1b0] sm:$0xff]  ;;  %v323_v28 = vld [vmem:[%s1404_s3 + $0x1a0] sm:$0xff]  ;;  %v332_v10 = vld [vmem:[%s1404_s3 + $0x1e8] sm:$0xff] }
  0x23   :  { %425 = vmatpush.msrb.mxu1 %v333_v43  ;;  %465 = vmatpush.msrb.mxu3 %v397_v49  ;;  %v177_v18 = vsel %vm176_vm2, %v85_v5, %v175_v14  ;;  %v357_v22 = vld [vmem:[%s1404_s3 + $0x2b0] sm:$0xff]  ;;  %v355_v29 = vld [vmem:[%s1404_s3 + $0x2a0] sm:$0xff]  ;;  %v302_v5 = vld [vmem:[%s1404_s3 + $0xf8] sm:$0xff] }
  0x24   :  { %406 = vmatpush.msrb.mxu0 %v299_v54  ;;  %446 = vmatpush.msrb.mxu2 %v363_v60  ;;  %v179_v21 = vsel %vm178_vm3, %v86_v6, %v177_v18  ;;  %v389_v23 = vld [vmem:[%s1404_s3 + $0x3b0] sm:$0xff]  ;;  %v387_v30 = vld [vmem:[%s1404_s3 + $0x3a0] sm:$0xff]  ;;  %v334_v6 = vld [vmem:[%s1404_s3 + $0x1f8] sm:$0xff] }
  0x25   :  { %426 = vmatpush.msrb.mxu1 %v331_v55  ;;  %466 = vmatpush.msrb.mxu3 %v395_v61  ;;  %v181_v24 = vsel %vm180_vm4, %v87_v9, %v179_v21  ;;  %v289_v31 = vld [vmem:[%s1404_s3 + $0x90] sm:$0xff]  ;;  %v287_v35 = vld [vmem:[%s1404_s3 + $0x80] sm:$0xff]  ;;  %v300_v9 = vld [vmem:[%s1404_s3 + $0xe8] sm:$0xff] }
  0x26   :  { %407 = vmatpush.msrb.mxu0 %v297_v2  ;;  %447 = vmatpush.msrb.mxu2 %v361_v7  ;;  %v183_v25 = vsel %vm182_vm5, %v88_v13, %v181_v24  ;;  %v321_v32 = vld [vmem:[%s1404_s3 + $0x190] sm:$0xff]  ;;  %v319_v36 = vld [vmem:[%s1404_s3 + $0x180] sm:$0xff]  ;;  %v298_v13 = vld [vmem:[%s1404_s3 + $0xd8] sm:$0xff] }
  0x27   :  { %427 = vmatpush.msrb.mxu1 %v329_v3  ;;  %467 = vmatpush.msrb.mxu3 %v393_v8  ;;  %v185_v26 = vsel %vm184_vm6, %v89_v17, %v183_v25  ;;  %v353_v33 = vld [vmem:[%s1404_s3 + $0x290] sm:$0xff]  ;;  %v351_v37 = vld [vmem:[%s1404_s3 + $0x280] sm:$0xff]  ;;  %v330_v14 = vld [vmem:[%s1404_s3 + $0x1d8] sm:$0xff] }
  0x28   :  { %408 = vmatpush.msrb.mxu0 %v295_v11  ;;  %448 = vmatpush.msrb.mxu2 %v359_v15  ;;  %v385_v34 = vld [vmem:[%s1404_s3 + $0x390] sm:$0xff]  ;;  %v383_v38 = vld [vmem:[%s1404_s3 + $0x380] sm:$0xff]  ;;  %v366_v11 = vld [vmem:[%s1404_s3 + $0x2f8] sm:$0xff] }
  0x29   :  { %428 = vmatpush.msrb.mxu1 %v327_v12  ;;  %468 = vmatpush.msrb.mxu3 %v391_v16  ;;  %v285_v39 = vld [vmem:[%s1404_s3 + $0x70] sm:$0xff]  ;;  %v283_v43 = vld [vmem:[%s1404_s3 + $0x60] sm:$0xff]  ;;  %v398_v12 = vld [vmem:[%s1404_s3 + $0x3f8] sm:$0xff] }
  0x2a   :  { %409 = vmatpush.msrb.mxu0 %v293_v19  ;;  %449 = vmatpush.msrb.mxu2 %v357_v22  ;;  %v317_v40 = vld [vmem:[%s1404_s3 + $0x170] sm:$0xff]  ;;  %v315_v44 = vld [vmem:[%s1404_s3 + $0x160] sm:$0xff]  ;;  %v364_v15 = vld [vmem:[%s1404_s3 + $0x2e8] sm:$0xff] }
  0x2b   :  { %429 = vmatpush.msrb.mxu1 %v325_v20  ;;  %469 = vmatpush.msrb.mxu3 %v389_v23  ;;  %v349_v41 = vld [vmem:[%s1404_s3 + $0x270] sm:$0xff]  ;;  %v347_v45 = vld [vmem:[%s1404_s3 + $0x260] sm:$0xff]  ;;  %v396_v16 = vld [vmem:[%s1404_s3 + $0x3e8] sm:$0xff] }
  0x2c   :  { %203 = vmatmul.f32.vlgmr.msra.gmra.mxu0 %v185_v26  ;;  %243 = vmatmul.f32.vlgmr.msra.gmra.mxu2 %v185_v26  ;;  %v381_v42 = vld [vmem:[%s1404_s3 + $0x370] sm:$0xff]  ;;  %v379_v46 = vld [vmem:[%s1404_s3 + $0x360] sm:$0xff]  ;;  %v296_v17 = vld [vmem:[%s1404_s3 + $0xc8] sm:$0xff] }
  0x2d   :  { %263 = vmatmul.f32.vlgmr.msra.gmra.mxu3 %v185_v26  ;;  %223 = vmatmul.f32.vlgmr.msra.gmra.mxu1 %v185_v26  ;;  %v281_v47 = vld [vmem:[%s1404_s3 + $0x50] sm:$0xff]  ;;  %v279_v51 = vld [vmem:[%s1404_s3 + $0x40] sm:$0xff]  ;;  %v328_v18 = vld [vmem:[%s1404_s3 + $0x1c8] sm:$0xff] }
  0x2e   :  { %410 = vmatpush.msrb.mxu0 %v291_v27  ;;  %430 = vmatpush.msrb.mxu1 %v323_v28  ;;  %v313_v48 = vld [vmem:[%s1404_s3 + $0x150] sm:$0xff]  ;;  %v311_v52 = vld [vmem:[%s1404_s3 + $0x140] sm:$0xff]  ;;  %v362_v19 = vld [vmem:[%s1404_s3 + $0x2d8] sm:$0xff] }
  0x2f   :  { %450 = vmatpush.msrb.mxu2 %v355_v29  ;;  %470 = vmatpush.msrb.mxu3 %v387_v30  ;;  %v345_v49 = vld [vmem:[%s1404_s3 + $0x250] sm:$0xff]  ;;  %v343_v53 = vld [vmem:[%s1404_s3 + $0x240] sm:$0xff]  ;;  %v394_v20 = vld [vmem:[%s1404_s3 + $0x3d8] sm:$0xff] }
  0x30   :  { %411 = vmatpush.msrb.mxu0 %v289_v31  ;;  %431 = vmatpush.msrb.mxu1 %v321_v32  ;;  %v377_v50 = vld [vmem:[%s1404_s3 + $0x350] sm:$0xff]  ;;  %v375_v54 = vld [vmem:[%s1404_s3 + $0x340] sm:$0xff]  ;;  %v294_v21 = vld [vmem:[%s1404_s3 + $0xb8] sm:$0xff] }
  0x31   :  { %451 = vmatpush.msrb.mxu2 %v353_v33  ;;  %471 = vmatpush.msrb.mxu3 %v385_v34  ;;  %v277_v55 = vld [vmem:[%s1404_s3 + $0x30] sm:$0xff]  ;;  %v275_v59 = vld [vmem:[%s1404_s3 + $0x20] sm:$0xff]  ;;  %v326_v22 = vld [vmem:[%s1404_s3 + $0x1b8] sm:$0xff] }
  0x32   :  { %412 = vmatpush.msrb.mxu0 %v287_v35  ;;  %432 = vmatpush.msrb.mxu1 %v319_v36  ;;  %v309_v56 = vld [vmem:[%s1404_s3 + $0x130] sm:$0xff]  ;;  %v307_v60 = vld [vmem:[%s1404_s3 + $0x120] sm:$0xff]  ;;  %v360_v23 = vld [vmem:[%s1404_s3 + $0x2c8] sm:$0xff] }
  0x33   :  { %452 = vmatpush.msrb.mxu2 %v351_v37  ;;  %472 = vmatpush.msrb.mxu3 %v383_v38  ;;  %v341_v57 = vld [vmem:[%s1404_s3 + $0x230] sm:$0xff]  ;;  %v339_v61 = vld [vmem:[%s1404_s3 + $0x220] sm:$0xff]  ;;  %v392_v24 = vld [vmem:[%s1404_s3 + $0x3c8] sm:$0xff] }
  0x34   :  { %413 = vmatpush.msrb.mxu0 %v285_v39  ;;  %433 = vmatpush.msrb.mxu1 %v317_v40  ;;  %v373_v58 = vld [vmem:[%s1404_s3 + $0x330] sm:$0xff]  ;;  %v371_v62 = vld [vmem:[%s1404_s3 + $0x320] sm:$0xff]  ;;  %v292_v25 = vld [vmem:[%s1404_s3 + $0xa8] sm:$0xff] }
  0x35   :  { %453 = vmatpush.msrb.mxu2 %v349_v41  ;;  %473 = vmatpush.msrb.mxu3 %v381_v42  ;;  %v273_v63 = vld [vmem:[%s1404_s3 + $0x10] sm:$0xff]  ;;  %v271_v3 = vld [vmem:[%s1404_s3] sm:$0xff]  ;;  %v324_v26 = vld [vmem:[%s1404_s3 + $0x1a8] sm:$0xff] }
  0x36   :  { %414 = vmatpush.msrb.mxu0 %v283_v43  ;;  %434 = vmatpush.msrb.mxu1 %v315_v44  ;;  %v305_v0 = vld [vmem:[%s1404_s3 + $0x110] sm:$0xff]  ;;  %v303_v4 = vld [vmem:[%s1404_s3 + $0x100] sm:$0xff]  ;;  %v358_v27 = vld [vmem:[%s1404_s3 + $0x2b8] sm:$0xff] }
  0x37   :  { %454 = vmatpush.msrb.mxu2 %v347_v45  ;;  %474 = vmatpush.msrb.mxu3 %v379_v46  ;;  %v337_v1 = vld [vmem:[%s1404_s3 + $0x210] sm:$0xff]  ;;  %v335_v7 = vld [vmem:[%s1404_s3 + $0x200] sm:$0xff]  ;;  %v390_v28 = vld [vmem:[%s1404_s3 + $0x3b8] sm:$0xff] }
  0x38   :  { %415 = vmatpush.msrb.mxu0 %v281_v47  ;;  %435 = vmatpush.msrb.mxu1 %v313_v48  ;;  %v369_v2 = vld [vmem:[%s1404_s3 + $0x310] sm:$0xff]  ;;  %v367_v8 = vld [vmem:[%s1404_s3 + $0x300] sm:$0xff]  ;;  %v290_v29 = vld [vmem:[%s1404_s3 + $0x98] sm:$0xff] }
  0x39   :  { %455 = vmatpush.msrb.mxu2 %v345_v49  ;;  %475 = vmatpush.msrb.mxu3 %v377_v50  ;;  %v322_v30 = vld [vmem:[%s1404_s3 + $0x198] sm:$0xff]  ;;  %v356_v31 = vld [vmem:[%s1404_s3 + $0x2a8] sm:$0xff] }
  0x3a   :  { %416 = vmatpush.msrb.mxu0 %v279_v51  ;;  %436 = vmatpush.msrb.mxu1 %v311_v52  ;;  %v388_v32 = vld [vmem:[%s1404_s3 + $0x3a8] sm:$0xff]  ;;  %v286_v35 = vld [vmem:[%s1404_s3 + $0x78] sm:$0xff] }
  0x3b   :  { %456 = vmatpush.msrb.mxu2 %v343_v53  ;;  %476 = vmatpush.msrb.mxu3 %v375_v54  ;;  %v288_v33 = vld [vmem:[%s1404_s3 + $0x88] sm:$0xff]  ;;  %v318_v37 = vld [vmem:[%s1404_s3 + $0x178] sm:$0xff] }
  0x3c   :  { %417 = vmatpush.msrb.mxu0 %v277_v55  ;;  %437 = vmatpush.msrb.mxu1 %v309_v56  ;;  %v320_v34 = vld [vmem:[%s1404_s3 + $0x188] sm:$0xff]  ;;  %v354_v38 = vld [vmem:[%s1404_s3 + $0x298] sm:$0xff] }
  0x3d   :  { %457 = vmatpush.msrb.mxu2 %v341_v57  ;;  %477 = vmatpush.msrb.mxu3 %v373_v58  ;;  %v284_v36 = vld [vmem:[%s1404_s3 + $0x68] sm:$0xff]  ;;  %v386_v39 = vld [vmem:[%s1404_s3 + $0x398] sm:$0xff] }
  0x3e   :  { %418 = vmatpush.msrb.mxu0 %v275_v59  ;;  %438 = vmatpush.msrb.mxu1 %v307_v60  ;;  %v282_v40 = vld [vmem:[%s1404_s3 + $0x58] sm:$0xff]  ;;  %v316_v41 = vld [vmem:[%s1404_s3 + $0x168] sm:$0xff] }
  0x3f   :  { %458 = vmatpush.msrb.mxu2 %v339_v61  ;;  %478 = vmatpush.msrb.mxu3 %v371_v62  ;;  %v352_v42 = vld [vmem:[%s1404_s3 + $0x288] sm:$0xff]  ;;  %v314_v45 = vld [vmem:[%s1404_s3 + $0x158] sm:$0xff] }
  0x40   :  { %419 = vmatpush.msrb.mxu0 %v273_v63  ;;  %439 = vmatpush.msrb.mxu1 %v305_v0  ;;  %v384_v43 = vld [vmem:[%s1404_s3 + $0x388] sm:$0xff]  ;;  %v350_v46 = vld [vmem:[%s1404_s3 + $0x278] sm:$0xff] }
  0x41   :  { %459 = vmatpush.msrb.mxu2 %v337_v1  ;;  %479 = vmatpush.msrb.mxu3 %v369_v2  ;;  %v280_v44 = vld [vmem:[%s1404_s3 + $0x48] sm:$0xff]  ;;  %v382_v47 = vld [vmem:[%s1404_s3 + $0x378] sm:$0xff] }
  0x42   :  { %420 = vmatpush.msrb.mxu0 %v271_v3  ;;  %440 = vmatpush.msrb.mxu1 %v303_v4  ;;  %v278_v48 = vld [vmem:[%s1404_s3 + $0x38] sm:$0xff]  ;;  %v312_v49 = vld [vmem:[%s1404_s3 + $0x148] sm:$0xff] }
  0x43   :  { %460 = vmatpush.msrb.mxu2 %v335_v7  ;;  %480 = vmatpush.msrb.mxu3 %v367_v8  ;;  %v348_v50 = vld [vmem:[%s1404_s3 + $0x268] sm:$0xff]  ;;  %v310_v53 = vld [vmem:[%s1404_s3 + $0x138] sm:$0xff]  ;;  %v154_v7 = vld [vmem:[%s1405_s2] sm:$0xf] }
  0x44   :  { %485 = vmatpush.msra.mxu0 %v302_v5  ;;  %505 = vmatpush.msra.mxu1 %v334_v6  ;;  %v380_v51 = vld [vmem:[%s1404_s3 + $0x368] sm:$0xff]  ;;  %v346_v54 = vld [vmem:[%s1404_s3 + $0x258] sm:$0xff]  ;;  %v156_v8 = vperm.slane %v154_v7, 0 }
  0x45   :  { %525 = vmatpush.msra.mxu2 %v366_v11  ;;  %545 = vmatpush.msra.mxu3 %v398_v12  ;;  %v276_v52 = vld [vmem:[%s1404_s3 + $0x28] sm:$0xff]  ;;  %v378_v55 = vld [vmem:[%s1404_s3 + $0x358] sm:$0xff] }
  0x46   :  { %486 = vmatpush.msra.mxu0 %v300_v9  ;;  %506 = vmatpush.msra.mxu1 %v332_v10  ;;  %v274_v56 = vld [vmem:[%s1404_s3 + $0x18] sm:$0xff]  ;;  %v308_v57 = vld [vmem:[%s1404_s3 + $0x128] sm:$0xff]  ;;  %v157_v9 = vperm.slane %v154_v7, 1 }
  0x47   :  { %526 = vmatpush.msra.mxu2 %v364_v15  ;;  %546 = vmatpush.msra.mxu3 %v396_v16  ;;  %v344_v58 = vld [vmem:[%s1404_s3 + $0x248] sm:$0xff]  ;;  %v306_v61 = vld [vmem:[%s1404_s3 + $0x118] sm:$0xff]  ;;  %v158_v15 = vperm.slane %v154_v7, 2 }
  0x48   :  { %487 = vmatpush.msra.mxu0 %v298_v13  ;;  %507 = vmatpush.msra.mxu1 %v330_v14  ;;  %v376_v59 = vld [vmem:[%s1404_s3 + $0x348] sm:$0xff]  ;;  %v342_v62 = vld [vmem:[%s1404_s3 + $0x238] sm:$0xff] }
  0x49   :  { %527 = vmatpush.msra.mxu2 %v362_v19  ;;  %547 = vmatpush.msra.mxu3 %v394_v20  ;;  %v272_v60 = vld [vmem:[%s1404_s3 + $0x8] sm:$0xff]  ;;  %v374_v63 = vld [vmem:[%s1404_s3 + $0x338] sm:$0xff]  ;;  %v581_v20 = vld [vmem:[%s1406_s5 + $0x70] sm:$0xff] }
  0x4a   :  { %488 = vmatpush.msra.mxu0 %v296_v17  ;;  %508 = vmatpush.msra.mxu1 %v328_v18  ;;  %v304_v0 = vld [vmem:[%s1404_s3 + $0x108] sm:$0xff]  ;;  %v338_v3 = vld [vmem:[%s1404_s3 + $0x218] sm:$0xff]  ;;  %v159_v18 = vperm.slane %v154_v7, 3 }
  0x4b   :  { %528 = vmatpush.msra.mxu2 %v360_v23  ;;  %548 = vmatpush.msra.mxu3 %v392_v24  ;;  %v340_v1 = vld [vmem:[%s1404_s3 + $0x228] sm:$0xff]  ;;  %v370_v4 = vld [vmem:[%s1404_s3 + $0x318] sm:$0xff] }
  0x4c   :  { %489 = vmatpush.msra.mxu0 %v294_v21  ;;  %509 = vmatpush.msra.mxu1 %v326_v22  ;;  %v372_v2 = vld [vmem:[%s1404_s3 + $0x328] sm:$0xff]  ;;  %v582_v16 = vld [vmem:[%s1406_s5 + $0x78] sm:$0xff]  ;;  %v597_v22 = vld [vmem:[%s1406_s5 + $0xf0] sm:$0xff] }
  0x4d   :  { %529 = vmatpush.msra.mxu2 %v358_v27  ;;  %549 = vmatpush.msra.mxu3 %v390_v28  ;;  %v336_v5 = vld [vmem:[%s1404_s3 + $0x208] sm:$0xff]  ;;  %v598_v19 = vld [vmem:[%s1406_s5 + $0xf8] sm:$0xff]  ;;  %v579_v28 = vld [vmem:[%s1406_s5 + $0x60] sm:$0xff] }
  0x4e   :  { %490 = vmatpush.msra.mxu0 %v292_v25  ;;  %510 = vmatpush.msra.mxu1 %v324_v26  ;;  %v368_v6 = vld [vmem:[%s1404_s3 + $0x308] sm:$0xff] }
  0x4f   :  { %530 = vmatpush.msra.mxu2 %v356_v31  ;;  %550 = vmatpush.msra.mxu3 %v388_v32  ;;  %v580_v25 = vld [vmem:[%s1406_s5 + $0x68] sm:$0xff]  ;;  %v577_v31 = vld [vmem:[%s1406_s5 + $0x50] sm:$0xff] }
  0x50   :  { %491 = vmatpush.msra.mxu0 %v290_v29  ;;  %511 = vmatpush.msra.mxu1 %v322_v30  ;;  %v578_v30 = vld [vmem:[%s1406_s5 + $0x58] sm:$0xff]  ;;  %v576_v32 = vld [vmem:[%s1406_s5 + $0x48] sm:$0xff] }
  0x51   :  { %531 = vmatpush.msra.mxu2 %v354_v38  ;;  %551 = vmatpush.msra.mxu3 %v386_v39  ;;  %v573_v38 = vld [vmem:[%s1406_s5 + $0x30] sm:$0xff] }
  0x52   :  { %492 = vmatpush.msra.mxu0 %v288_v33  ;;  %512 = vmatpush.msra.mxu1 %v320_v34  ;;  %v596_v33 = vld [vmem:[%s1406_s5 + $0xe8] sm:$0xff]  ;;  %v575_v34 = vld [vmem:[%s1406_s5 + $0x40] sm:$0xff]  ;;  %v593_v39 = vld [vmem:[%s1406_s5 + $0xd0] sm:$0xff] }
  0x53   :  { %532 = vmatpush.msra.mxu2 %v352_v42  ;;  %552 = vmatpush.msra.mxu3 %v384_v43  ;;  %v571_v42 = vld [vmem:[%s1406_s5 + $0x20] sm:$0xff] }
  0x54   :  { %493 = vmatpush.msra.mxu0 %v286_v35  ;;  %513 = vmatpush.msra.mxu1 %v318_v37  ;;  %v595_v35 = vld [vmem:[%s1406_s5 + $0xe0] sm:$0xff]  ;;  %v594_v37 = vld [vmem:[%s1406_s5 + $0xd8] sm:$0xff] }
  0x55   :  { %533 = vmatpush.msra.mxu2 %v350_v46  ;;  %553 = vmatpush.msra.mxu3 %v382_v47  ;;  %v591_v43 = vld [vmem:[%s1406_s5 + $0xc0] sm:$0xff]  ;;  %v569_v46 = vld [vmem:[%s1406_s5 + $0x10] sm:$0xff] }
  0x56   :  { %494 = vmatpush.msra.mxu0 %v284_v36  ;;  %514 = vmatpush.msra.mxu1 %v316_v41  ;;  %v574_v36 = vld [vmem:[%s1406_s5 + $0x38] sm:$0xff]  ;;  %v592_v41 = vld [vmem:[%s1406_s5 + $0xc8] sm:$0xff]  ;;  %v589_v47 = vld [vmem:[%s1406_s5 + $0xb0] sm:$0xff] }
  0x57   :  { %534 = vmatpush.msra.mxu2 %v348_v50  ;;  %554 = vmatpush.msra.mxu3 %v380_v51  ;;  %v567_v50 = vld [vmem:[%s1406_s5] sm:$0xff] }
  0x58   :  { %495 = vmatpush.msra.mxu0 %v282_v40  ;;  %515 = vmatpush.msra.mxu1 %v314_v45  ;;  %v572_v40 = vld [vmem:[%s1406_s5 + $0x28] sm:$0xff]  ;;  %v590_v45 = vld [vmem:[%s1406_s5 + $0xb8] sm:$0xff]  ;;  %v587_v51 = vld [vmem:[%s1406_s5 + $0xa0] sm:$0xff] }
  0x59   :  { %535 = vmatpush.msra.mxu2 %v346_v54  ;;  %555 = vmatpush.msra.mxu3 %v378_v55  ;;  %v584_v54 = vld [vmem:[%s1406_s5 + $0x88] sm:$0xff]  ;;  %v583_v55 = vld [vmem:[%s1406_s5 + $0x80] sm:$0xff] }
  0x5a   :  { %496 = vmatpush.msra.mxu0 %v280_v44  ;;  %516 = vmatpush.msra.mxu1 %v312_v49  ;;  %v570_v44 = vld [vmem:[%s1406_s5 + $0x18] sm:$0xff]  ;;  %v588_v49 = vld [vmem:[%s1406_s5 + $0xa8] sm:$0xff] }
  0x5b   :  { %536 = vmatpush.msra.mxu2 %v344_v58  ;;  %556 = vmatpush.msra.mxu3 %v376_v59 }
  0x5c   :  { %497 = vmatpush.msra.mxu0 %v278_v48  ;;  %517 = vmatpush.msra.mxu1 %v310_v53  ;;  %v568_v48 = vld [vmem:[%s1406_s5 + $0x8] sm:$0xff]  ;;  %v585_v53 = vld [vmem:[%s1406_s5 + $0x90] sm:$0xff] }
  0x5d   :  { %537 = vmatpush.msra.mxu2 %v342_v62  ;;  %557 = vmatpush.msra.mxu3 %v374_v63 }
  0x5e   :  { %498 = vmatpush.msra.mxu0 %v276_v52  ;;  %518 = vmatpush.msra.mxu1 %v308_v57  ;;  %v586_v52 = vld [vmem:[%s1406_s5 + $0x98] sm:$0xff] }
  0x5f   :  { %538 = vmatpush.msra.mxu2 %v340_v1  ;;  %558 = vmatpush.msra.mxu3 %v372_v2 }
  0x60   :  { %499 = vmatpush.msra.mxu0 %v274_v56  ;;  %519 = vmatpush.msra.mxu1 %v306_v61  ;;  %v399_v56 = vld [vmem:[%s1408_s4] sm:$0x3] }
  0x61   :  { %539 = vmatpush.msra.mxu2 %v338_v3  ;;  %559 = vmatpush.msra.mxu3 %v370_v4  ;;  %v401_v57 = vperm.slane %v399_v56, 0  ;;  %v402_v62 = vperm.slane %v399_v56, 1 }
  0x62   :  { %500 = vmatpush.msra.mxu0 %v272_v60  ;;  %520 = vmatpush.msra.mxu1 %v304_v0 }
  0x63   :  { %540 = vmatpush.msra.mxu2 %v336_v5  ;;  %560 = vmatpush.msra.mxu3 %v368_v6 }
  0xa9   :  { %v204_v10 = vpop.f32.mrf.mxu0 }
  0xaa   :  { %v205_v11 = vadd.f32 %v204_v10, %v156_v8  ;;  %v224_v12 = vpop.f32.mrf.mxu1 }
  0xab   :  { %v225_v13 = vadd.f32 %v224_v12, %v157_v9 }
  0xac   :  { %v267_v14 = vmax.f32 %v205_v11, 0.0 }
  0xad   :  { %v268_v17 = vmax.f32 %v225_v13, 0.0  ;;  %v648_v13 = vld [vmem:[%s1407_s6] ss:$0 sm:$0xff] }
  0xae   :  { %421 = vmatmul.f32.vlgmr.msrb.gmra.mxu0 %v267_v14 }
  0xaf   :  { %v244_v21 = vpop.f32.mrf.mxu2  ;;  %441 = vmatmul.f32.vlgmr.msrb.gmra.mxu1 %v268_v17  ;;  %603 = vmatpush.msrb.mxu0 %v582_v16 }
  0xb0   :  { %v245_v23 = vadd.f32 %v244_v21, %v158_v15  ;;  %v264_v24 = vpop.f32.mrf.mxu3  ;;  %623 = vmatpush.msrb.mxu1 %v598_v19 }
  0xb1   :  { %v265_v26 = vadd.f32 %v264_v24, %v159_v18  ;;  %604 = vmatpush.msrb.mxu0 %v581_v20 }
  0xb2   :  { %v269_v27 = vmax.f32 %v245_v23, 0.0  ;;  %624 = vmatpush.msrb.mxu1 %v597_v22 }
  0xb3   :  { %v270_v29 = vmax.f32 %v265_v26, 0.0  ;;  %605 = vmatpush.msrb.mxu0 %v580_v25 }
  0xb4   :  { %461 = vmatmul.f32.vlgmr.msrb.gmra.mxu2 %v269_v27  ;;  %625 = vmatpush.msrb.mxu1 %v596_v33 }
  0xb5   :  { %481 = vmatmul.f32.vlgmr.msrb.gmra.mxu3 %v270_v29  ;;  %606 = vmatpush.msrb.mxu0 %v579_v28 }
  0xb6   :  { %501 = vmatmul.f32.vlgmr.msra.gmra.mxu0 %v267_v14  ;;  %626 = vmatpush.msrb.mxu1 %v595_v35 }
  0xb7   :  { %521 = vmatmul.f32.vlgmr.msra.gmra.mxu1 %v268_v17  ;;  %607 = vmatpush.msrb.mxu0 %v578_v30 }
  0xb8   :  { %627 = vmatpush.msrb.mxu1 %v594_v37 }
  0xb9   :  { %608 = vmatpush.msrb.mxu0 %v577_v31 }
  0xba   :  { %628 = vmatpush.msrb.mxu1 %v593_v39 }
  0xbb   :  { %609 = vmatpush.msrb.mxu0 %v576_v32 }
  0xbc   :  { %541 = vmatmul.f32.vlgmr.msra.gmra.mxu2 %v269_v27  ;;  %629 = vmatpush.msrb.mxu1 %v592_v41 }
  0xbd   :  { %561 = vmatmul.f32.vlgmr.msra.gmra.mxu3 %v270_v29  ;;  %610 = vmatpush.msrb.mxu0 %v575_v34 }
  0xbe   :  { %630 = vmatpush.msrb.mxu1 %v591_v43 }
  0xbf   :  { %611 = vmatpush.msrb.mxu0 %v574_v36 }
  0xc0   :  { %631 = vmatpush.msrb.mxu1 %v590_v45 }
  0xc1   :  { %612 = vmatpush.msrb.mxu0 %v573_v38 }
  0xc2   :  { %632 = vmatpush.msrb.mxu1 %v589_v47 }
  0xc3   :  { %613 = vmatpush.msrb.mxu0 %v572_v40 }
  0xc4   :  { %633 = vmatpush.msrb.mxu1 %v588_v49 }
  0xc5   :  { %614 = vmatpush.msrb.mxu0 %v571_v42 }
  0xc6   :  { %634 = vmatpush.msrb.mxu1 %v587_v51 }
  0xc7   :  { %615 = vmatpush.msrb.mxu0 %v570_v44 }
  0xc8   :  { %635 = vmatpush.msrb.mxu1 %v586_v52 }
  0xc9   :  { %616 = vmatpush.msrb.mxu0 %v569_v46 }
  0xca   :  { %636 = vmatpush.msrb.mxu1 %v585_v53 }
  0xcb   :  { %617 = vmatpush.msrb.mxu0 %v568_v48 }
  0xcc   :  { %637 = vmatpush.msrb.mxu1 %v584_v54 }
  0xcd   :  { %618 = vmatpush.msrb.mxu0 %v567_v50 }
  0xce   :  { %638 = vmatpush.msrb.mxu1 %v583_v55 }
 0x12b   :  { %v422_v58 = vpop.f32.mrf.mxu0 }
 0x12c   :  { %v423_v59 = vadd.f32 %v422_v58, %v401_v57  ;;  %v442_v60 = vpop.f32.mrf.mxu1 }
 0x12e   :  { %v443_v61 = vadd.f32 %v442_v60, %v423_v59 }
 0x133   :  { %v502_v63 = vpop.f32.mrf.mxu0 }
 0x134   :  { %v503_v3 = vadd.f32 %v502_v63, %v402_v62  ;;  %v522_v5 = vpop.f32.mrf.mxu1 }
 0x136   :  { %v523_v7 = vadd.f32 %v522_v5, %v503_v3 }
 0x137   :  { %v462_v0 = vpop.f32.mrf.mxu2 }
 0x138   :  { %v463_v1 = vadd.f32 %v462_v0, %v443_v61  ;;  %v482_v2 = vpop.f32.mrf.mxu3 }
 0x13a   :  { %v483_v4 = vadd.f32 %v482_v2, %v463_v1 }
 0x13c   :  { %v565_v6 = vmax.f32 %v483_v4, 0.0 }
 0x13e   :  { %619 = vmatmul.f32.vlgmr.msrb.gmra.mxu0 %v565_v6 }
 0x13f   :  { %v542_v8 = vpop.f32.mrf.mxu2 }
 0x140   :  { %v543_v9 = vadd.f32 %v542_v8, %v523_v7  ;;  %v562_v10 = vpop.f32.mrf.mxu3 }
 0x142   :  { %v563_v11 = vadd.f32 %v562_v10, %v543_v9 }
 0x144   :  { %v566_v12 = vmax.f32 %v563_v11, 0.0 }
 0x146   :  { %639 = vmatmul.f32.vlgmr.msrb.gmra.mxu1 %v566_v12 }
 0x1bb   :  { %v620_v14 = vpop.f32.mrf.mxu0 }
 0x1bc   :  { %v621_v15 = vadd.f32 %v648_v13, %v620_v14 }
 0x1c3   :  { %v640_v16 = vpop.f32.mrf.mxu1 }
 0x1c4   :  { %v641_v17 = vadd.f32 %v640_v16, %v621_v15 }
 0x1c6   :  { %643 = vst [vmem:[%s1409_s7] sm:$0xff] %v641_v17 }

</bundles_post_ra>
